<compile_context>
chip_gen: v6e
topology: v6e:2x2x1
jax: 0.10.0
libtpu: 0.0.40
codegen_flags: <defaults>
</compile_context>

<pallas_src>
import jax
import jax.numpy as jnp
from jax.experimental import pallas as pl
from jax.experimental.pallas import tpu as pltpu


def _erf_f32(x):
    # Abramowitz & Stegun 7.1.26 rational approximation (max abs err ~1.5e-7).
    # Only mul/add/abs/where/exp plus one EUP reciprocal.
    a1 = jnp.float32(0.254829592)
    a2 = jnp.float32(-0.284496736)
    a3 = jnp.float32(1.421413741)
    a4 = jnp.float32(-1.453152027)
    a5 = jnp.float32(1.061405429)
    p = jnp.float32(0.3275911)
    s = jnp.where(x >= 0.0, jnp.float32(1.0), jnp.float32(-1.0))
    ax = jnp.abs(x)
    t = pl.reciprocal(1.0 + p * ax, approx=True)      # EUP slot, ~2^-12 rel err
    poly = ((((a5 * t + a4) * t + a3) * t + a2) * t + a1) * t
    return s * (1.0 - poly * jnp.exp(-ax * ax))


def out_layer_kernel(x_ref, w_ref, b_ref, wp_ref, bp_ref, o_ref):
    """Fused OutLayer forward; batch lives in the lane (N) dimension.

    x_ref  : (CK6, TB) bf16   im2col'd input window (rows = c*6*L2 + 6*t + j)
    w_ref  : (H2, CK6) bf16   conv1∘conv2∘flatten∘linear composed weight
    b_ref  : (H2, 1)  f32     composed bias
    wp_ref : (H2, 1)  f32     proj weight as a column (VPU path)
    bp_ref : (1,)     f32     proj bias, scalar in SMEM
    o_ref  : (1, TB)  f32     transposed output (wrapper reshapes, free)
    """
    # Single MXU pass: everything up to GELU is one matmul + bias.
    lin = jnp.dot(w_ref[...], x_ref[...],
                  preferred_element_type=jnp.float32) + b_ref[...]
    # Exact GELU in f32.
    g = 0.5 * lin * (1.0 + _erf_f32(lin * jnp.float32(0.7071067811865475)))
    # proj (H2 -> 1): VPU multiply + sublane reduction + SMEM scalar bias.
    out = jnp.sum(g * wp_ref[...], axis=0, keepdims=True) + bp_ref[0]
    o_ref[...] = out.astype(o_ref.dtype)


def prepare_out_layer_params(params):
    """One-time (parameter-load time) preprocessing. NOT on the per-call path.

    conv2(conv1(.)) with kernel==stride on both is a single non-overlapping
    conv with kernel 6, stride 6; flatten(-2) + linear is another linear map.
    Their exact composition is:
        lin[b, h] = bbig[h] + sum_{c,t,j} Wbig[h, c*6*L2 + 6*t + j] * x[b, c, 6*t + j]
    """
    w1, b1, w2, b2, wl, bl, wp, bp = params
    _, C, K1 = w1.shape               # (in_c//2, in_c, 3)
    C2, _, K2 = w2.shape              # (in_c//4, in_c//2, 2)
    H2, H = wl.shape                  # (hidden//2, hidden), hidden = C2 * L2
    assert H % C2 == 0, "hidden_c must equal (in_c//4) * L2"
    L2 = H // C2

    # conv1 o conv2 -> one conv: W12[c2, c, 3*k2 + k1] = sum_c1 w2[c2,c1,k2]*w1[c1,c,k1]
    W12 = jnp.einsum("zqk,qcl->zckl", w2, w1).reshape(C2, C, K2 * K1)
    b12 = b2 + jnp.einsum("zqk,q->z", w2, b1)

    # fold flatten(-2) + linear:
    #   Wbig[h, c, t, j] = sum_c2 wl[h, c2*L2 + t] * W12[c2, c, j]
    wl3 = wl.reshape(H2, C2, L2)
    Wbig = jnp.einsum("hzt,zcj->hctj", wl3, W12).reshape(H2, C * L2 * K2 * K1)
    bbig = bl + jnp.einsum("hzt,z->h", wl3, b12)

    return (Wbig.astype(jnp.bfloat16),               # (H2, C*6*L2) MXU operand
            bbig.reshape(H2, 1).astype(jnp.float32), # composed bias column
            wp.reshape(H2, 1).astype(jnp.float32),   # proj weight column (VPU)
            bp.reshape(1).astype(jnp.float32))       # proj bias (SMEM scalar)


def _batch_tile(B):
    # Lane-dense batch tiles when B is large; single full-array block otherwise.
    if B % 128 != 0:
        return B
    tb = min(B, 1024)
    while B % tb != 0:
        tb -= 128
    return tb


@jax.jit
def out_layer_forward(x, prep):
    """x: (B, in_c, L) float32, NCL layout (nn.Conv1d). Returns (B, 1) float32."""
    Wbig, bbig, wp_col, bp = prep
    B, C, L = x.shape
    H2, CK6 = Wbig.shape
    win = CK6 // C                    # = 6 * L2, input positions actually used
    assert win <= L

    # Per-call wrapper glue is only this im2col (slice + reshape + transpose +
    # bf16 cast, one small XLA fusion):  xcol[c*win + 6*t + j, b] = x[b, c, 6*t + j]
    xcol = x[:, :, :win].reshape(B, CK6).T.astype(jnp.bfloat16)   # (CK6, B)

    TB = _batch_tile(B)
    nb = B // TB

    # TODO(synk): when embedded in the full Efficientformer, fuse this into the
    # producing layer's kernel or cross-call-prefetch the static Wbig (P10) to
    # hide the weight DMA and the ~0.35us launch cost entirely.
    out_t = pl.pallas_call(
        out_layer_kernel,
        out_shape=jax.ShapeDtypeStruct((1, B), jnp.float32),
        grid=(nb,),
        in_specs=[
            pl.BlockSpec((CK6, TB), lambda ib: (0, ib)),
            pl.BlockSpec((H2, CK6), lambda ib: (0, 0)),
            pl.BlockSpec((H2, 1), lambda ib: (0, 0)),
            pl.BlockSpec((H2, 1), lambda ib: (0, 0)),
            pl.BlockSpec(memory_space=pltpu.MemorySpace.SMEM),
        ],
        out_specs=pl.BlockSpec((1, TB), lambda ib: (0, ib)),
        compiler_params=pltpu.CompilerParams(
            dimension_semantics=("parallel",)),   # batch tiles: v7x 2-TC split
    )(xcol, Wbig, bbig, wp_col, bp)

    # (1, B) -> (B, 1): row-major identical, free reshape.
    return out_t.reshape(B, 1)


if __name__ == "__main__":
    # Small shapes consistent with the module: flatten(-2) width
    # (in_c//4) * L2 must equal hidden_c.
    B, in_c, L = 2, 16, 48
    C1, C2 = in_c // 2, in_c // 4
    L1 = (L - 3) // 3 + 1                 # 16
    L2 = (L1 - 2) // 2 + 1                # 8
    hidden_c = C2 * L2                    # 32

    key = jax.random.PRNGKey(0)
    ks = jax.random.split(key, 9)

    def unif(k, shape, fan_in):
        bound = 1.0 / jnp.sqrt(jnp.float32(fan_in))
        return jax.random.uniform(k, shape, jnp.float32, -bound, bound)

    # Deterministic, PyTorch-default-style init (uniform +/- 1/sqrt(fan_in)).
    w1 = unif(ks[0], (C1, in_c, 3), in_c * 3)
    b1 = unif(ks[1], (C1,), in_c * 3)
    w2 = unif(ks[2], (C2, C1, 2), C1 * 2)
    b2 = unif(ks[3], (C2,), C1 * 2)
    wl = unif(ks[4], (hidden_c // 2, hidden_c), hidden_c)
    bl = unif(ks[5], (hidden_c // 2,), hidden_c)
    wp = unif(ks[6], (1, hidden_c // 2), hidden_c // 2)
    bp = unif(ks[7], (1,), hidden_c // 2)
    x = jax.random.normal(ks[8], (B, in_c, L), jnp.float32)

    params = (w1, b1, w2, b2, wl, bl, wp, bp)

    # Parameter-load-time preprocessing (hoisted out of the per-call path).
    prep = prepare_out_layer_params(params)

    out = jax.block_until_ready(out_layer_forward(x, prep))

    # Pure-f32 JAX reference of the PyTorch forward.
    xw = x[:, :, :L1 * 3].reshape(B, in_c, L1, 3)
    o1 = jnp.einsum("bctk,ock->bot", xw, w1) + b1[None, :, None]
    o1w = o1[:, :, :L2 * 2].reshape(B, C1, L2, 2)
    o2 = jnp.einsum("bctk,ock->bot", o1w, w2) + b2[None, :, None]
    flat_ref = o2.reshape(B, -1)
    lin_ref = flat_ref @ wl.T + bl
    g_ref = jax.nn.gelu(lin_ref, approximate=False)
    ref = g_ref @ wp.T + bp

    assert out.shape == (B, 1)
    # bf16 MXU operands (f32 accumulation) -> compare at bf16-level tolerance.
    assert jnp.allclose(out, ref, atol=2e-2, rtol=2e-2), (out, ref)
    print("KERNEL_OK")
</pallas_src>

<mosaic_0001>
module attributes {stable_mosaic.version = 11 : i64} {
  func.func @out_layer_kernel(%arg0: i32, %arg1: memref<768x2xbf16, #tpu.memory_space<vmem>>, %arg2: memref<16x768xbf16, #tpu.memory_space<vmem>>, %arg3: memref<16x1xf32, #tpu.memory_space<vmem>>, %arg4: memref<16x1xf32, #tpu.memory_space<vmem>>, %arg5: memref<1xf32, #tpu.memory_space<smem>>, %arg6: memref<1x2xf32, #tpu.memory_space<vmem>>) attributes {dimension_semantics = [#tpu.dimension_semantics<parallel>], iteration_bounds = array<i64: 1>, scalar_prefetch = 0 : i64, scratch_operands = 0 : i64, tpu.core_type = #tpu.core_type<tc>, window_params = [{transform_indices = @transform_0, window_bounds = array<i64: 768, 2>}, {pipeline_mode = #tpu.pipeline_mode<synchronous>, transform_indices = @transform_1, window_bounds = array<i64: 16, 768>}, {pipeline_mode = #tpu.pipeline_mode<synchronous>, transform_indices = @transform_2, window_bounds = array<i64: 16, 1>}, {pipeline_mode = #tpu.pipeline_mode<synchronous>, transform_indices = @transform_3, window_bounds = array<i64: 16, 1>}, {transform_indices = @transform_4, window_bounds = array<i64: 1>}, {transform_indices = @transform_5, window_bounds = array<i64: 1, 2>}]} {
    %c0 = arith.constant 0 : index
    %c0_0 = arith.constant 0 : index
    %0 = vector.load %arg2[%c0, %c0_0] : memref<16x768xbf16, #tpu.memory_space<vmem>>, vector<16x768xbf16>
    %c0_1 = arith.constant 0 : index
    %c0_2 = arith.constant 0 : index
    %1 = vector.load %arg1[%c0_1, %c0_2] : memref<768x2xbf16, #tpu.memory_space<vmem>>, vector<768x2xbf16>
    %cst = arith.constant dense<0.000000e+00> : vector<16x2xf32>
    %2 = tpu.matmul %0, %1, %cst {dimension_numbers = #tpu.dot_dimension_numbers<[1], [0], [0], [1], [0, 0, 1, 1], [], []>} : vector<16x768xbf16>, vector<768x2xbf16>, vector<16x2xf32> -> vector<16x2xf32>
    %c0_3 = arith.constant 0 : index
    %c0_4 = arith.constant 0 : index
    %3 = vector.load %arg3[%c0_3, %c0_4] : memref<16x1xf32, #tpu.memory_space<vmem>>, vector<16x1xf32>
    %4 = vector.broadcast %3 : vector<16x1xf32> to vector<16x2xf32>
    %5 = arith.addf %2, %4 : vector<16x2xf32>
    %cst_5 = arith.constant 5.000000e-01 : f32
    %6 = vector.broadcast %cst_5 : f32 to vector<16x2xf32>
    %7 = arith.mulf %6, %5 : vector<16x2xf32>
    %cst_6 = arith.constant 0.707106769 : f32
    %8 = vector.broadcast %cst_6 : f32 to vector<16x2xf32>
    %9 = arith.mulf %5, %8 : vector<16x2xf32>
    %cst_7 = arith.constant 0.000000e+00 : f32
    %10 = vector.broadcast %cst_7 : f32 to vector<16x2xf32>
    %11 = arith.cmpf oge, %9, %10 : vector<16x2xf32>
    %cst_8 = arith.constant 1.000000e+00 : f32
    %cst_9 = arith.constant -1.000000e+00 : f32
    %12 = vector.broadcast %cst_8 : f32 to vector<16x2xf32>
    %13 = vector.broadcast %cst_9 : f32 to vector<16x2xf32>
    %14 = arith.select %11, %12, %13 : vector<16x2xi1>, vector<16x2xf32>
    %15 = math.absf %9 : vector<16x2xf32>
    %cst_10 = arith.constant 0.327591091 : f32
    %16 = vector.broadcast %cst_10 : f32 to vector<16x2xf32>
    %17 = arith.mulf %16, %15 : vector<16x2xf32>
    %cst_11 = arith.constant 1.000000e+00 : f32
    %18 = vector.broadcast %cst_11 : f32 to vector<16x2xf32>
    %19 = arith.addf %18, %17 : vector<16x2xf32>
    %20 = tpu.reciprocal %19 {approx = true} : vector<16x2xf32> -> vector<16x2xf32>
    %cst_12 = arith.constant 1.06140542 : f32
    %21 = vector.broadcast %cst_12 : f32 to vector<16x2xf32>
    %22 = arith.mulf %21, %20 : vector<16x2xf32>
    %cst_13 = arith.constant -1.45315206 : f32
    %23 = vector.broadcast %cst_13 : f32 to vector<16x2xf32>
    %24 = arith.addf %22, %23 : vector<16x2xf32>
    %25 = arith.mulf %24, %20 : vector<16x2xf32>
    %cst_14 = arith.constant 1.42141378 : f32
    %26 = vector.broadcast %cst_14 : f32 to vector<16x2xf32>
    %27 = arith.addf %25, %26 : vector<16x2xf32>
    %28 = arith.mulf %27, %20 : vector<16x2xf32>
    %cst_15 = arith.constant -0.284496725 : f32
    %29 = vector.broadcast %cst_15 : f32 to vector<16x2xf32>
    %30 = arith.addf %28, %29 : vector<16x2xf32>
    %31 = arith.mulf %30, %20 : vector<16x2xf32>
    %cst_16 = arith.constant 0.254829586 : f32
    %32 = vector.broadcast %cst_16 : f32 to vector<16x2xf32>
    %33 = arith.addf %31, %32 : vector<16x2xf32>
    %34 = arith.mulf %33, %20 : vector<16x2xf32>
    %cst_17 = arith.constant 0.000000e+00 : f32
    %35 = vector.broadcast %cst_17 : f32 to vector<16x2xf32>
    %36 = arith.subf %35, %15 : vector<16x2xf32>
    %37 = arith.mulf %36, %15 : vector<16x2xf32>
    %38 = math.exp %37 : vector<16x2xf32>
    %39 = arith.mulf %34, %38 : vector<16x2xf32>
    %cst_18 = arith.constant 1.000000e+00 : f32
    %40 = vector.broadcast %cst_18 : f32 to vector<16x2xf32>
    %41 = arith.subf %40, %39 : vector<16x2xf32>
    %42 = arith.mulf %14, %41 : vector<16x2xf32>
    %cst_19 = arith.constant 1.000000e+00 : f32
    %43 = vector.broadcast %cst_19 : f32 to vector<16x2xf32>
    %44 = arith.addf %43, %42 : vector<16x2xf32>
    %45 = arith.mulf %7, %44 : vector<16x2xf32>
    %c0_20 = arith.constant 0 : index
    %c0_21 = arith.constant 0 : index
    %46 = vector.load %arg4[%c0_20, %c0_21] : memref<16x1xf32, #tpu.memory_space<vmem>>, vector<16x1xf32>
    %47 = vector.broadcast %46 : vector<16x1xf32> to vector<16x2xf32>
    %48 = arith.mulf %45, %47 : vector<16x2xf32>
    %cst_22 = arith.constant dense<0.000000e+00> : vector<2xf32>
    %49 = vector.multi_reduction <add>, %48, %cst_22 [0] : vector<16x2xf32> to vector<2xf32>
    %50 = vector.shape_cast %49 : vector<2xf32> to vector<1x2xf32>
    %c0_23 = arith.constant 0 : index
    %51 = memref.load %arg5[%c0_23] : memref<1xf32, #tpu.memory_space<smem>>
    %52 = vector.broadcast %51 : f32 to vector<1x2xf32>
    %53 = arith.addf %50, %52 : vector<1x2xf32>
    %c0_24 = arith.constant 0 : index
    %c0_25 = arith.constant 0 : index
    %54 = vector.load %arg6[%c0_24, %c0_25] : memref<1x2xf32, #tpu.memory_space<vmem>>, vector<1x2xf32>
    tpu.vector_store %arg6[%c0_24, %c0_25], %53 {strides = array<i32>} : memref<1x2xf32, #tpu.memory_space<vmem>>, vector<1x2xf32>,
    return
  }
  func.func @transform_0(%arg0: i32) -> (i32, i32) {
    %c0_i32 = arith.constant 0 : i32
    %c0_i32_0 = arith.constant 0 : i32
    return %c0_i32, %arg0 : i32, i32
  }
  func.func @transform_1(%arg0: i32) -> (i32, i32) {
    %c0_i32 = arith.constant 0 : i32
    %c0_i32_0 = arith.constant 0 : i32
    %c0_i32_1 = arith.constant 0 : i32
    return %c0_i32, %c0_i32_0 : i32, i32
  }
  func.func @transform_2(%arg0: i32) -> (i32, i32) {
    %c0_i32 = arith.constant 0 : i32
    %c0_i32_0 = arith.constant 0 : i32
    %c0_i32_1 = arith.constant 0 : i32
    return %c0_i32, %c0_i32_0 : i32, i32
  }
  func.func @transform_3(%arg0: i32) -> (i32, i32) {
    %c0_i32 = arith.constant 0 : i32
    %c0_i32_0 = arith.constant 0 : i32
    %c0_i32_1 = arith.constant 0 : i32
    return %c0_i32, %c0_i32_0 : i32, i32
  }
  func.func @transform_4(%arg0: i32) -> i32 {
    %c0_i32 = arith.constant 0 : i32
    %c0_i32_0 = arith.constant 0 : i32
    return %c0_i32 : i32
  }
  func.func @transform_5(%arg0: i32) -> (i32, i32) {
    %c0_i32 = arith.constant 0 : i32
    %c0_i32_0 = arith.constant 0 : i32
    return %c0_i32, %arg0 : i32, i32
  }
}

</mosaic_0001>

<bundles_post_ra>
// kernel: out_layer_forward.1
= control target key start
LH: loop header
LB: loop body
LE: loop exit
PB: predicated region body
PF: predicated region fallthrough
CT: control target
= control target key end

     0   :  { %v885_v2 = vmov 0   ;;  %s1098_s0 = inlined_call_operand.vmem [shape: bf16[768,2], index: 0, kind: input, shape index: {}]   ;;  %s1099_s1 = inlined_call_operand.vmem [shape: bf16[16,768], index: 1, kind: input, shape index: {}]   ;;  %s1100_s2 = inlined_call_operand.vmem [shape: f32[16,1], index: 2, kind: input, shape index: {}]   ;;  %s1101_s3 = inlined_call_operand.vmem [shape: f32[16,1], index: 3, kind: input, shape index: {}]   ;;  %s1102_s4 = inlined_call_operand.<no memory space> [shape: f32[1], index: 4, kind: input, shape index: {}]   ;;  %s1103_s5 = inlined_call_operand.hbm [shape: f32[1,2], index: 5, kind: output, shape index: {}]  }
   0x1   :  { %v798_v0 = vld [vmem:[%s1098_s0 + $0x78] sm:$0xff]   ;;  %796 = vset.pattern.permute.xlu0 %v885_v2  ;;  %797 = vset.pattern.permute.xlu1 %v885_v2  ;;  %v802_v5 = vld [vmem:[%s1098_s0 + $0x70] sm:$0xff]   ;;  %v806_v9 = vld [vmem:[%s1098_s0 + $0x68] sm:$0xff]  }
   0x2   :  { %v799_v1 = vld [vmem:[%s1098_s0 + $0x38] sm:$0xff]   ;;  %727 = vmatprep.subr.bf16.mxu0 %v798_v0  ;;  %v803_v6 = vld [vmem:[%s1098_s0 + $0x30] sm:$0xff]   ;;  %v807_v10 = vld [vmem:[%s1098_s0 + $0x28] sm:$0xff]  }
   0x3   :  { %v800_v3 = vld [vmem:[%s1098_s0 + $0xf8] sm:$0xff]   ;;  %728 = vmatpush3.bf16.msra.mxu0 %v799_v1  ;;  %v804_v7 = vld [vmem:[%s1098_s0 + $0xf0] sm:$0xff]   ;;  %v808_v11 = vld [vmem:[%s1098_s0 + $0xe8] sm:$0xff]  }
   0x4   :  { %v801_v4 = vld [vmem:[%s1098_s0 + $0xb8] sm:$0xff]   ;;  %749 = vmatprep.subr.bf16.mxu1 %v800_v3  ;;  %729 = vmatprep.subr.bf16.mxu0 %v802_v5  ;;  %v805_v8 = vld [vmem:[%s1098_s0 + $0xb0] sm:$0xff]   ;;  %v809_v12 = vld [vmem:[%s1098_s0 + $0xa8] sm:$0xff]  }
   0x5   :  { %750 = vmatpush3.bf16.msra.mxu1 %v801_v4  ;;  %v810_v13 = vld [vmem:[%s1098_s0 + $0x60] sm:$0xff]   ;;  %v814_v17 = vld [vmem:[%s1098_s0 + $0x58] sm:$0xff]   ;;  %v818_v21 = vld [vmem:[%s1098_s0 + $0x50] sm:$0xff]  }
   0x6   :  { %751 = vmatprep.subr.bf16.mxu1 %v804_v7  ;;  %v811_v14 = vld [vmem:[%s1098_s0 + $0x20] sm:$0xff]   ;;  %v815_v18 = vld [vmem:[%s1098_s0 + $0x18] sm:$0xff]   ;;  %v819_v22 = vld [vmem:[%s1098_s0 + $0x10] sm:$0xff]  }
   0x7   :  { %730 = vmatpush3.bf16.msra.mxu0 %v803_v6  ;;  %v812_v15 = vld [vmem:[%s1098_s0 + $0xe0] sm:$0xff]   ;;  %v816_v19 = vld [vmem:[%s1098_s0 + $0xd8] sm:$0xff]   ;;  %v820_v23 = vld [vmem:[%s1098_s0 + $0xd0] sm:$0xff]  }
   0x8   :  { %731 = vmatprep.subr.bf16.mxu0 %v806_v9  ;;  %v813_v16 = vld [vmem:[%s1098_s0 + $0xa0] sm:$0xff]   ;;  %v817_v20 = vld [vmem:[%s1098_s0 + $0x98] sm:$0xff]   ;;  %v821_v24 = vld [vmem:[%s1098_s0 + $0x90] sm:$0xff]  }
   0x9   :  { %752 = vmatpush3.bf16.msra.mxu1 %v805_v8  ;;  %v822_v25 = vld [vmem:[%s1098_s0 + $0x48] sm:$0xff]   ;;  %v826_v29 = vld [vmem:[%s1098_s0 + $0x40] sm:$0xff]   ;;  %v833_v35 = vld [vmem:[%s1098_s0 + $0x178] sm:$0xff]  }
   0xa   :  { %753 = vmatprep.subr.bf16.mxu1 %v808_v11  ;;  %v823_v26 = vld [vmem:[%s1098_s0 + $0x8] sm:$0xff]   ;;  %v827_v30 = vld [vmem:[%s1098_s0] sm:$0xff]   ;;  %v837_v38 = vld [vmem:[%s1098_s0 + $0x138] sm:$0xff]  }
   0xb   :  { %732 = vmatpush3.bf16.msra.mxu0 %v807_v10  ;;  %v824_v27 = vld [vmem:[%s1098_s0 + $0xc8] sm:$0xff]   ;;  %v828_v31 = vld [vmem:[%s1098_s0 + $0xc0] sm:$0xff]   ;;  %v838_v39 = vld [vmem:[%s1098_s0 + $0x170] sm:$0xff]  }
   0xc   :  { %733 = vmatprep.subr.bf16.mxu0 %v810_v13  ;;  %v825_v28 = vld [vmem:[%s1098_s0 + $0x88] sm:$0xff]   ;;  %v829_v32 = vld [vmem:[%s1099_s1] ss:$24 sps:$4 sm:$0xff]   ;;  %v831_v33 = vld [vmem:[%s1099_s1 + $0x4] ss:$24 sps:$4 sm:$0xff]  }
   0xd   :  { %754 = vmatpush3.bf16.msra.mxu1 %v809_v12  ;;  %v832_v34 = vld [vmem:[%s1098_s0 + $0x80] sm:$0xff]   ;;  %487 = vmatprep.mubr.bf16.mxu0 %v831_v33  ;;  %v839_v40 = vld [vmem:[%s1098_s0 + $0x130] sm:$0xff]   ;;  %v840_v41 = vld [vmem:[%s1098_s0 + $0x168] sm:$0xff]  }
   0xe   :  { %755 = vmatprep.subr.bf16.mxu1 %v812_v15  ;;  %v834_v36 = vld [vmem:[%s1099_s1 + $0x8] ss:$24 sps:$4 sm:$0xff]   ;;  %v836_v37 = vld [vmem:[%s1099_s1 + $0xc] ss:$24 sps:$4 sm:$0xff]   ;;  %v844_v45 = vld [vmem:[%s1098_s0 + $0x158] sm:$0xff]  }
   0xf   :  { %734 = vmatpush3.bf16.msra.mxu0 %v811_v14  ;;  %528 = vmatprep.mubr.bf16.mxu1 %v836_v37  ;;  %v841_v42 = vld [vmem:[%s1098_s0 + $0x128] sm:$0xff]   ;;  %v842_v43 = vld [vmem:[%s1098_s0 + $0x160] sm:$0xff]   ;;  %v845_v46 = vld [vmem:[%s1098_s0 + $0x118] sm:$0xff]  }
  0x10   :  { %735 = vmatprep.subr.bf16.mxu0 %v814_v17  ;;  %v843_v44 = vld [vmem:[%s1098_s0 + $0x120] sm:$0xff]   ;;  %v846_v47 = vld [vmem:[%s1098_s0 + $0x150] sm:$0xff]  }
  0x11   :  { %756 = vmatpush3.bf16.msra.mxu1 %v813_v16  ;;  %v854_v48 = vld [vmem:[%s1099_s1 + $0x14] ss:$24 sps:$4 sm:$0xff]   ;;  %v125_v49 = vld [vmem:[%s1100_s2] sm:$0xff] }
  0x12   :  { %757 = vmatprep.subr.bf16.mxu1 %v816_v19  ;;  %v630_v50 = vld [vmem:[%s1101_s3] sm:$0xff]  ;;  %129 = vperm.xlu0 %796, %v125_v49  }
  0x13   :  { %736 = vmatpush3.bf16.msra.mxu0 %v815_v18 }
  0x14   :  { %737 = vmatprep.subr.bf16.mxu0 %v818_v21 }
  0x15   :  { %758 = vmatpush3.bf16.msra.mxu1 %v817_v20 }
  0x16   :  { %759 = vmatprep.subr.bf16.mxu1 %v820_v23 }
  0x17   :  { %738 = vmatpush3.bf16.msra.mxu0 %v819_v22 }
  0x18   :  { %739 = vmatprep.subr.bf16.mxu0 %v822_v25 }
  0x19   :  { %760 = vmatpush3.bf16.msra.mxu1 %v821_v24 }
  0x1a   :  { %761 = vmatprep.subr.bf16.mxu1 %v824_v27 }
  0x1b   :  { %740 = vmatpush3.bf16.msra.mxu0 %v823_v26 }
  0x1c   :  { %741 = vmatprep.subr.bf16.mxu0 %v826_v29 }
  0x1d   :  { %762 = vmatpush3.bf16.msra.mxu1 %v825_v28 }
  0x1e   :  { %763 = vmatprep.subr.bf16.mxu1 %v828_v31 }
  0x1f   :  { %742 = vmatpush3.bf16.msra.mxu0 %v827_v30 }
  0x20   :  { %771 = vmatprep.subr.bf16.mxu0 %v833_v35 }
  0x21   :  { %764 = vmatpush3.bf16.msra.mxu1 %v832_v34 }
  0x22   :  { %488 = vmatmul.mubr.bf16.vlgmr.msra.gmra.mxu0 %v829_v32 }
  0x23   :  { %772 = vmatpush3.bf16.msra.mxu0 %v837_v38  ;;  %569 = vmatprep.mubr.bf16.mxu0 %v854_v48 }
  0x24   :  { %529 = vmatmul.mubr.bf16.vlgmr.msra.gmra.mxu1 %v834_v36  ;;  %773 = vmatprep.subr.bf16.mxu0 %v838_v39 }
  0x27   :  { %774 = vmatpush3.bf16.msra.mxu0 %v839_v40 }
  0x28   :  { %775 = vmatprep.subr.bf16.mxu0 %v840_v41 }
  0x2b   :  { %776 = vmatpush3.bf16.msra.mxu0 %v841_v42 }
  0x2c   :  { %777 = vmatprep.subr.bf16.mxu0 %v842_v43 }
  0x2f   :  { %778 = vmatpush3.bf16.msra.mxu0 %v843_v44 }
  0x30   :  { %779 = vmatprep.subr.bf16.mxu0 %v844_v45 }
  0x31   :  { %11 = vsyncpa [#allocation4], 0  ;;  %v847_v51 = vld [vmem:[%s1098_s0 + $0x110] sm:$0xff]   ;;  %v126_v52 = vld [vmem:[%s1100_s2 + $0x8] sm:$0xff]  ;;  %634 = vperm.xlu1 %797, %v630_v50   ;;  %vm644_vm2 = vcmask 15360   ;;  %s887_s7 = smov [#allocation3]  }
  0x32   :  { %v848_v53 = vld [vmem:[%s1098_s0 + $0x148] sm:$0xff]   ;;  %134 = vperm.xlu0 %796, %v126_v52   ;;  %v850_v56 = vld [vmem:[%s1098_s0 + $0x140] sm:$0xff]   ;;  %s665_s8 = sshll.u32 %s887_s7, 4  ;;  %vm657_vm3 = vcmask 8192   ;;  %s666_s8 = int_to_ptr.vmem [resolvable:$true] %s665_s8 }
  0x33   :  { %780 = vmatpush3.bf16.msra.mxu0 %v845_v46  ;;  %v631_v54 = vld [vmem:[%s1101_s3 + $0x8] sm:$0xff]  ;;  %v851_v57 = vld [vmem:[%s1098_s0 + $0x100] sm:$0xff]   ;;  %s863_s9 = scalar_lea.vmem %s666_s8, 16  ;;  %s867_s10 = scalar_lea.vmem %s666_s8, 32 }
  0x34   :  { %781 = vmatprep.subr.bf16.mxu0 %v846_v47  ;;  %v849_v55 = vld [vmem:[%s1098_s0 + $0x108] sm:$0xff]   ;;  %p864_p0 = scmp.ne.s32.totalorder %s666_s8, %s863_s9  ;;  %p868_p1 = scmp.lt.s32.totalorder %s666_s8, %s666_s8 }
  0x35   :  { %639 = vperm.xlu1 %797, %v631_v54   ;;  %v852_v58 = vld [vmem:[%s1099_s1 + $0x10] ss:$24 sps:$4 sm:$0xff]   ;;  %p869_p2 = scmp.lt.s32.totalorder %s867_s10, %s863_s9 }
  0x37   :  { %782 = vmatpush3.bf16.msra.mxu0 %v847_v51  ;;  %p870_p3 = por %p869_p2, %p868_p1 }
  0x38   :  { %783 = vmatprep.subr.bf16.mxu0 %v848_v53 }
  0x39   :  { %p871_p4 = pnand %p870_p3, %p864_p0 }
  0x3b   :  { %784 = vmatpush3.bf16.msra.mxu0 %v849_v55 }
  0x3c   :  { %785 = vmatprep.subr.bf16.mxu0 %v850_v56 }
  0x3f   :  { %786 = vmatpush3.bf16.msra.mxu0 %v851_v57 }
  0x42   :  { %570 = vmatmul.mubr.bf16.vlgmr.msra.gmra.mxu0 %v852_v58 }
  0x8d   :  { %v130_v0 = vpop.permute.xlu0 %129 }
  0xad   :  { %v135_v7 = vpop.permute.xlu0 %134 }
  0xe2   :  { %v743_v59 = vpop.f32.mrf.mxu0 }
  0xe4   :  { %v744_v60 = vpop.f32.mrf.mxu0  ;;  %v765_v61 = vpop.f32.mrf.mxu1 }
  0xe5   :  { %v745_v1 = vadd.f32 %v744_v60, %v743_v59  ;;  %v886_v59 = vmov -1.0  }
  0xe6   :  { %v746_v62 = vpop.f32.mrf.mxu0  ;;  %v766_v63 = vpop.f32.mrf.mxu1 }
  0xe7   :  { %v490_v4 = vadd.f32 %v745_v1, %v130_v0  ;;  %v767_v5 = vadd.f32 %v766_v63, %v765_v61 }
  0xe8   :  { %v747_v2 = vpop.f32.mrf.mxu0  ;;  %v768_v3 = vpop.f32.mrf.mxu1 }
  0xe9   :  { %v748_v6 = vadd.f32 %v747_v2, %v746_v62  ;;  %v531_v11 = vadd.f32 %v767_v5, %v490_v4  ;;  %v635_v2 = vpop.permute.xlu1 %634 }
  0xea   :  { %v769_v8 = vpop.f32.mrf.mxu1 }
  0xeb   :  { %v493_v12 = vadd.f32 %v748_v6, %v135_v7  ;;  %v770_v13 = vadd.f32 %v769_v8, %v768_v3 }
  0xed   :  { %v534_v18 = vadd.f32 %v770_v13, %v493_v12 }
 0x102   :  { %v787_v9 = vpop.f32.mrf.mxu0 }
 0x104   :  { %v788_v10 = vpop.f32.mrf.mxu0 }
 0x105   :  { %v789_v14 = vadd.f32 %v788_v10, %v787_v9  ;;  %v640_v10 = vpop.permute.xlu1 %639 }
 0x106   :  { %v790_v15 = vpop.f32.mrf.mxu0 }
 0x107   :  { %v572_v16 = vadd.f32 %v789_v14, %v531_v11 }
 0x108   :  { %v791_v17 = vpop.f32.mrf.mxu0 }
 0x109   :  { %v580_v19 = vmul.f32 0.70710677, %v572_v16  ;;  %v792_v20 = vadd.f32 %v791_v17, %v790_v15  ;;  %v578_v63 = vmul.f32 0.5, %v572_v16 }
 0x10b   :  { %v586_v21 = vand.u32 2147483647, %v580_v19  ;;  %v575_v22 = vadd.f32 %v792_v20, %v534_v18  ;;  %vm582_vm0 = vcmp.ge.f32.partialorder %v580_v19, 0.0  ;;  %v655_v20 = vstv %s1102_s4 }
 0x10c   :  { %v584_v60 = vsel %vm582_vm0, 1.0, %v886_v59 }
 0x10d   :  { %v588_v23 = vmul.f32 0.3275911, %v586_v21  ;;  %v581_v24 = vmul.f32 0.70710677, %v575_v22  ;;  %v612_v29 = vsub.f32 0.0, %v586_v21  ;;  %v579_v6 = vmul.f32 0.5, %v575_v22 }
 0x10f   :  { %v590_v25 = vadd.f32 1.0, %v588_v23  ;;  %v587_v26 = vand.u32 2147483647, %v581_v24  ;;  %v614_v30 = vmul.f32 %v612_v29, %v586_v21  ;;  %vm583_vm1 = vcmp.ge.f32.partialorder %v581_v24, 0.0 }
 0x110   :  { %v585_v3 = vsel %vm583_vm1, 1.0, %v886_v59 }
 0x111   :  { %855 = vrcp.f32 %v590_v25  ;;  %v589_v27 = vmul.f32 0.3275911, %v587_v26  ;;  %v613_v31 = vsub.f32 0.0, %v587_v26  ;;  %v616_v33 = vmul.f32 1.442695, %v614_v30 }
 0x113   :  { %v591_v28 = vadd.f32 1.0, %v589_v27  ;;  %v615_v34 = vmul.f32 %v613_v31, %v587_v26 }
 0x115   :  { %857 = vrcp.f32 %v591_v28  ;;  %v618_v38 = vmul.f32 1.442695, %v615_v34 }
 0x116   :  { %859 = vpow2.f32 %v616_v33 }
 0x117   :  { %861 = vpow2.f32 %v618_v38 }
 0x11e   :  { %v856_v32 = vpop.eup %855 }
 0x11f   :  { %v594_v35 = vmul.f32 1.0614054, %v856_v32 }
 0x121   :  { %v596_v36 = vadd.f32 -1.4531521, %v594_v35 }
 0x122   :  { %v858_v37 = vpop.eup %857 }
 0x123   :  { %v598_v39 = vmul.f32 %v856_v32, %v596_v36  ;;  %v595_v40 = vmul.f32 1.0614054, %v858_v37  ;;  %v860_v53 = vpop.eup %859 }
 0x124   :  { %v862_v58 = vpop.eup %861 }
 0x125   :  { %v600_v41 = vadd.f32 1.4214138, %v598_v39  ;;  %v597_v42 = vadd.f32 -1.4531521, %v595_v40 }
 0x127   :  { %v602_v43 = vmul.f32 %v856_v32, %v600_v41  ;;  %v599_v44 = vmul.f32 %v858_v37, %v597_v42 }
 0x129   :  { %v604_v45 = vadd.f32 -0.28449672, %v602_v43  ;;  %v601_v46 = vadd.f32 1.4214138, %v599_v44 }
 0x12b   :  { %v606_v47 = vmul.f32 %v856_v32, %v604_v45  ;;  %v603_v48 = vmul.f32 %v858_v37, %v601_v46 }
 0x12d   :  { %v608_v49 = vadd.f32 0.2548296, %v606_v47  ;;  %v605_v50 = vadd.f32 -0.28449672, %v603_v48 }
 0x12f   :  { %v610_v51 = vmul.f32 %v856_v32, %v608_v49  ;;  %v607_v52 = vmul.f32 %v858_v37, %v605_v50 }
 0x131   :  { %v620_v54 = vmul.f32 %v860_v53, %v610_v51  ;;  %v609_v55 = vadd.f32 0.2548296, %v607_v52 }
 0x133   :  { %v622_v56 = vsub.f32 1.0, %v620_v54  ;;  %v611_v57 = vmul.f32 %v858_v37, %v609_v55 }
 0x135   :  { %v624_v61 = vmul.f32 %v622_v56, %v584_v60  ;;  %v621_v62 = vmul.f32 %v862_v58, %v611_v57 }
 0x137   :  { %v626_v0 = vadd.f32 1.0, %v624_v61  ;;  %v623_v1 = vsub.f32 1.0, %v621_v62 }
 0x139   :  { %v628_v4 = vmul.f32 %v626_v0, %v578_v63  ;;  %v625_v5 = vmul.f32 %v623_v1, %v585_v3 }
 0x13b   :  { %v627_v7 = vadd.f32 1.0, %v625_v5  ;;  %v642_v8 = vmul.f32 %v635_v2, %v628_v4 }
 0x13d   :  { %v629_v9 = vmul.f32 %v627_v7, %v579_v6  ;;  %v645_v12 = vsel %vm644_vm2, %v642_v8, 0.0 }
 0x13f   :  { %v643_v11 = vmul.f32 %v640_v10, %v629_v9 }
 0x141   :  { %v646_v13 = vsel %vm644_vm2, %v643_v11, 0.0 }
 0x142   :  { %v647_v14 = vadd.f32 %v646_v13, %v645_v12 }
 0x144   :  { %v648_v15 = vrot.slane %v647_v14, 4 }
 0x146   :  { %v649_v17 = vadd.f32 %v648_v15, %v647_v14 }
 0x148   :  { %v650_v18 = vrot.slane %v649_v17, 2 }
 0x14a   :  { %v651_v16 = vadd.f32 %v650_v18, %v649_v17 }
 0x14c   :  { %v652_v19 = vrot.slane %v651_v16, 1 }
 0x14e   :  { %v653_v21 = vadd.f32 %v652_v19, %v651_v16 }
 0x150   :  { %v656_v22 = vadd.f32 %v655_v20, %v653_v21 }
 0x152   :  { %658 = vst.msk [vmem:[#allocation3] sm:$0x1] %vm657_vm3, %v656_v22 }
 0x153   :  { %874 = shalt.err (!%p871_p4)
}
 0x154   :  { %668 = dma.vmem_to_hbm [thread:$0]  %s666_s8, 16, %s1103_s5, [#allocation4]  }
 0x155   :  { %883 = dma.done.wait [#allocation4], 16  }
 0x156   :  { %884 = vsyncadd [#allocation4], 4294967280 }
 0x157   :  { %672 = vsyncpa [#allocation4], 1 }

</bundles_post_ra>
